<compile_context>
chip_gen: v5e
topology: v5e:2x2
jax: 0.10.0
libtpu: 0.0.40
codegen_flags: <defaults>
</compile_context>

<pallas_src>
import functools

import jax
import jax.numpy as jnp
from jax.experimental import pallas as pl
from jax.experimental.pallas import tpu as pltpu


# ----------------------------------------------------------------------------
# Primary path: direct chunked HBM -> HBM DMA (no VMEM / vreg transit).
# ----------------------------------------------------------------------------

_MAX_OUTSTANDING = 4                      # sub-DMAs in flight per grid step
_TARGET_CHUNK_BYTES = 16 * 1024 * 1024    # ~16 MiB of payload per grid step
_MIN_SUB_BYTES = 512 * 1024               # don't split a chunk below this
_CHUNK_ALIGN_ELEMS = 1024                 # chunk / sub-chunk starts stay aligned
_MIN_SPLIT_BYTES = 4 * 1024 * 1024        # force >= 2 chunks above this (v7x: 2 TCs)


def _round_up(x: int, m: int) -> int:
    return ((x + m - 1) // m) * m


def _sub_sizes(n_elems: int, itemsize: int):
    """Static sub-DMA sizes for one chunk (every sub-DMA starts 1024-aligned)."""
    n_sub = max(1, min(_MAX_OUTSTANDING, (n_elems * itemsize) // _MIN_SUB_BYTES))
    sub = (n_elems // n_sub) // _CHUNK_ALIGN_ELEMS * _CHUNK_ALIGN_ELEMS
    if n_sub == 1 or sub == 0:
        return (n_elems,)
    return (sub,) * (n_sub - 1) + (n_elems - sub * (n_sub - 1),)


@functools.lru_cache(maxsize=None)
def _dma_identity_call(total: int, dtype_name: str):
    """Build (and cache) a pallas_call that copies a flat (total,) array HBM->HBM."""
    dtype = jnp.dtype(dtype_name)
    itemsize = dtype.itemsize
    total_bytes = total * itemsize

    # Chunking: ~16 MiB per grid step; >= 2 (even) chunks for mid/large arrays
    # so dimension_semantics=("parallel",) can shard across v7x's two cores.
    target_elems = max(_CHUNK_ALIGN_ELEMS, _TARGET_CHUNK_BYTES // itemsize)
    n_chunks = pl.cdiv(total, target_elems)
    if total_bytes >= _MIN_SPLIT_BYTES:
        n_chunks = max(n_chunks, 2)
    if n_chunks > 1 and n_chunks % 2:
        n_chunks += 1
    chunk = _round_up(pl.cdiv(total, n_chunks), _CHUNK_ALIGN_ELEMS)
    n_chunks = pl.cdiv(total, chunk)
    last = total - (n_chunks - 1) * chunk          # static, 1 <= last <= chunk

    def _copy_chunk(x_hbm, o_hbm, sem, start, n_elems):
        copies = []
        off = start
        for s, sz in enumerate(_sub_sizes(n_elems, itemsize)):
            cp = pltpu.make_async_copy(
                x_hbm.at[pl.ds(off, sz)],
                o_hbm.at[pl.ds(off, sz)],
                sem.at[s],
            )
            cp.start()                             # issue; keep several in flight
            copies.append(cp)
            off = off + sz
        for cp in copies:
            cp.wait()

    def kernel(x_hbm, o_hbm, sem):
        if n_chunks == 1:
            _copy_chunk(x_hbm, o_hbm, sem, 0, last)
            return
        i = pl.program_id(0)
        start = pl.multiple_of(i * chunk, _CHUNK_ALIGN_ELEMS)

        @pl.when(i < n_chunks - 1)
        def _():
            _copy_chunk(x_hbm, o_hbm, sem, start, chunk)

        @pl.when(i == n_chunks - 1)
        def _():
            _copy_chunk(x_hbm, o_hbm, sem, start, last)

    return jax.jit(
        pl.pallas_call(
            kernel,
            out_shape=jax.ShapeDtypeStruct((total,), dtype),
            grid=(n_chunks,),
            in_specs=[pl.BlockSpec(memory_space=pl.ANY)],
            out_specs=pl.BlockSpec(memory_space=pl.ANY),
            scratch_shapes=[pltpu.SemaphoreType.DMA((_MAX_OUTSTANDING,))],
            compiler_params=pltpu.CompilerParams(
                dimension_semantics=("parallel",),
            ),
            cost_estimate=pl.CostEstimate(
                flops=0, transcendentals=0, bytes_accessed=2 * total_bytes
            ),
        )
    )


# ----------------------------------------------------------------------------
# Fallback path: lane-dense BlockSpec/VMEM copy (auto-pipelined HBM<->VMEM).
# Used only if the direct HBM->HBM DMA path fails to lower on this toolchain.
# ----------------------------------------------------------------------------

_LANE_CANDIDATES = (8192, 4096, 2048, 1024, 512, 256, 128)
_TARGET_TILE_BYTES = 4 * 1024 * 1024      # ~16 MiB live with in+out double-buffering


def _vmem_copy_kernel(x_ref, o_ref):
    o_ref[...] = x_ref[...]


def _blockspec_copy_2d(x2d: jax.Array) -> jax.Array:
    rows, lane = x2d.shape
    itemsize = jnp.dtype(x2d.dtype).itemsize
    sublane = 8 * max(1, 4 // itemsize)   # 8 (f32) / 16 (bf16) / 32 (int8) packing
    max_rows = max(1, _TARGET_TILE_BYTES // (lane * itemsize))
    if rows <= max_rows:
        block_rows = rows                 # full extent is always a legal block dim
    else:
        block_rows = max(sublane, (max_rows // sublane) * sublane)
    spec = pl.BlockSpec((block_rows, lane), lambda i: (i, 0))
    nbytes = rows * lane * itemsize
    return pl.pallas_call(
        _vmem_copy_kernel,
        out_shape=jax.ShapeDtypeStruct((rows, lane), x2d.dtype),
        grid=(pl.cdiv(rows, block_rows),),
        in_specs=[spec],
        out_specs=spec,
        compiler_params=pltpu.CompilerParams(
            dimension_semantics=("parallel",),
            vmem_limit_bytes=32 * 1024 * 1024,
        ),
        cost_estimate=pl.CostEstimate(
            flops=0, transcendentals=0, bytes_accessed=2 * nbytes
        ),
    )(x2d)


def _blockspec_copy_flat(flat: jax.Array) -> jax.Array:
    total = flat.shape[0]
    lane = next((c for c in _LANE_CANDIDATES if total % c == 0), None)
    if lane is not None:
        return _blockspec_copy_2d(flat.reshape(total // lane, lane)).reshape(total)
    # Ragged totals on the (rare) fallback path only: pad to 128 lanes and slice back.
    pad = (-total) % 128
    y2d = _blockspec_copy_2d(jnp.pad(flat, (0, pad)).reshape(-1, 128))
    return y2d.reshape(-1)[:total]


# ----------------------------------------------------------------------------
# Public wrapper: IdentityTransform.forward(x) = x (bit-exact copy).
# ----------------------------------------------------------------------------

_DIRECT_DMA_OK = True   # flipped off if the HBM->HBM DMA path fails to lower


def identity_transform(x: jax.Array) -> jax.Array:
    global _DIRECT_DMA_OK
    orig_shape = x.shape
    total = x.size
    if total == 0:
        return x
    flat = x.reshape(total)               # zero-copy bitcast under jit
    if _DIRECT_DMA_OK:
        try:
            y = _dma_identity_call(total, jnp.dtype(x.dtype).name)(flat)
            return y.reshape(orig_shape)
        except Exception:                 # pragma: no cover - toolchain fallback
            _DIRECT_DMA_OK = False
    return _blockspec_copy_flat(flat).reshape(orig_shape)


if __name__ == "__main__":
    key = jax.random.PRNGKey(0)
    x = jax.random.normal(key, (2, 4, 16, 16), dtype=jnp.float32)

    y = identity_transform(x)
    jax.block_until_ready(y)

    assert y.shape == x.shape and y.dtype == x.dtype
    assert bool(jnp.array_equal(y, x))
    print("KERNEL_OK")
</pallas_src>

<mosaic_0001>
module attributes {stable_mosaic.version = 11 : i64} {
  func.func @_vmem_copy_kernel(%arg0: i32, %arg1: memref<1x2048xf32, #tpu.memory_space<vmem>>, %arg2: memref<1x2048xf32, #tpu.memory_space<vmem>>) attributes {dimension_semantics = [#tpu.dimension_semantics<parallel>], iteration_bounds = array<i64: 1>, scalar_prefetch = 0 : i64, scratch_operands = 0 : i64, tpu.core_type = #tpu.core_type<tc>, window_params = [{transform_indices = @transform_0, window_bounds = array<i64: 1, 2048>}, {transform_indices = @transform_1, window_bounds = array<i64: 1, 2048>}]} {
    %c0 = arith.constant 0 : index
    %c0_0 = arith.constant 0 : index
    %0 = vector.load %arg1[%c0, %c0_0] : memref<1x2048xf32, #tpu.memory_space<vmem>>, vector<1x2048xf32>
    %c0_1 = arith.constant 0 : index
    %c0_2 = arith.constant 0 : index
    %1 = vector.load %arg2[%c0_1, %c0_2] : memref<1x2048xf32, #tpu.memory_space<vmem>>, vector<1x2048xf32>
    tpu.vector_store %arg2[%c0_1, %c0_2], %0 {strides = array<i32>} : memref<1x2048xf32, #tpu.memory_space<vmem>>, vector<1x2048xf32>,
    return
  }
  func.func @transform_0(%arg0: i32) -> (i32, i32) {
    %c0_i32 = arith.constant 0 : i32
    %c0_i32_0 = arith.constant 0 : i32
    return %arg0, %c0_i32 : i32, i32
  }
  func.func @transform_1(%arg0: i32) -> (i32, i32) {
    %c0_i32 = arith.constant 0 : i32
    %c0_i32_0 = arith.constant 0 : i32
    return %arg0, %c0_i32 : i32, i32
  }
}

</mosaic_0001>

<bundles_post_ra>
// kernel: tpu_custom_call.1
= control target key start
LH: loop header
LB: loop body
LE: loop exit
PB: predicated region body
PF: predicated region fallthrough
CT: control target
= control target key end

     0   :  { %6 = vsyncpa [#allocation3], 0  ;;  %s116_s0 = inlined_call_operand.hbm [shape: f32[1,2048], index: 0, kind: input, shape index: {}]   ;;  %s117_s1 = inlined_call_operand.hbm [shape: f32[1,2048], index: 1, kind: output, shape index: {}]  }
   0x1   :  { %7 = vsyncpa [#allocation4], 0  ;;  %s13_s8 = sshll.u32 %s116_s0, 4  ;;  %s98_s9 = smov [#allocation2]   ;;  %s14_s8 = int_to_ptr.hbm [resolvable:$true] %s13_s8 }
   0x2   :  { %s15_s10 = sshll.u32 %s98_s9, 4  ;;  %s16_s10 = int_to_ptr.vmem [resolvable:$true] %s15_s10 }
   0x3   :  { %18 = dma.hbm_to_vmem [thread:$0]  %s14_s8, 256, %s16_s10, [#allocation3]  }
   0x4   :  { %94 = dma.done.wait [#allocation3], 256  }
   0x5   :  { %95 = vsyncadd [#allocation3], 4294967040  ;;  %s99_s11 = smov [#allocation5]   ;;  %s34_s15 = sshll.u32 %s117_s1, 4  ;;  %v23_v0 = vld [vmem:[#allocation2] sm:$0xff]  ;;  %v24_v1 = vld [vmem:[#allocation2 + $0x8] sm:$0xff]  ;;  %s35_s15 = int_to_ptr.hbm [resolvable:$true] %s34_s15 }
   0x6   :  { %s32_s12 = sshll.u32 %s99_s11, 4  ;;  %25 = vst [vmem:[#allocation5] sm:$0xff] %v23_v0  ;;  %s33_s12 = int_to_ptr.vmem [resolvable:$true] %s32_s12 }
   0x7   :  { %26 = vst [vmem:[#allocation5 + $0x8] sm:$0xff] %v24_v1 }
   0x8   :  { %37 = dma.vmem_to_hbm [thread:$0]  %s33_s12, 256, %s35_s15, [#allocation4]  }
   0x9   :  { %96 = dma.done.wait [#allocation4], 256  }
   0xa   :  { %97 = vsyncadd [#allocation4], 4294967040 }
   0xb   :  { %42 = vsyncpa [#allocation3], 1 }
   0xc   :  { %43 = vsyncpa [#allocation4], 1 }

</bundles_post_ra>
